<compile_context>
chip_gen: v6e
topology: v6e:2x2x1
jax: 0.10.0
libtpu: 0.0.40
codegen_flags: <defaults>
</compile_context>

<pallas_src>
import math

import jax
import jax.numpy as jnp
from jax import lax
from jax.experimental import pallas as pl
from jax.experimental.pallas import tpu as pltpu


# Contract the last (H) axis of both operands; no batch dims.
_CONTRACT_H = (((1,), (1,)), ((), ()))


# ---------------------------------------------------------------------------
# Kernels
# ---------------------------------------------------------------------------
def _dot_score_kernel(dec_ref, enc_ref, out_ref):
    # dec: (1, H) resident, enc: (TS, H) streamed  ->  out: (1, TS) lane-dense.
    out_ref[...] = lax.dot_general(
        dec_ref[...], enc_ref[...],
        dimension_numbers=_CONTRACT_H,
        preferred_element_type=jnp.float32,
    ).astype(out_ref.dtype)


def _general_score_kernel(dec_ref, wt_ref, enc_ref, out_ref):
    # Fused Linear(H,H,bias=False) + score.  The (1,H)@(H,H) projection is
    # ~2*H^2 flops and is recomputed every grid step against the resident
    # pre-transposed weight: far cheaper than a second pallas_call dispatch,
    # and safe under megacore "parallel" grids (no cross-core scratch carry).
    q = jnp.dot(dec_ref[...], wt_ref[...], preferred_element_type=jnp.float32)
    out_ref[...] = lax.dot_general(
        q, enc_ref[...],
        dimension_numbers=_CONTRACT_H,
        preferred_element_type=jnp.float32,
    ).astype(out_ref.dtype)


def _concat_score_kernel(dec_ref, wt_ref, v_ref, enc_ref, out_ref):
    # Broadcast add in input precision (VPU); MXU operands in compute dtype
    # with f32 accumulation; tanh in f32 on the EUP.  Each output column only
    # depends on its own encoder row, so a masked partial last block is safe.
    x = enc_ref[...] + dec_ref[...]                        # (TS, H)
    proj = jnp.dot(x.astype(wt_ref.dtype), wt_ref[...],
                   preferred_element_type=jnp.float32)     # (TS, H) f32 acc
    proj = jnp.tanh(proj)                                  # f32
    out_ref[...] = lax.dot_general(
        v_ref[...], proj.astype(v_ref.dtype),
        dimension_numbers=_CONTRACT_H,
        preferred_element_type=jnp.float32,
    ).astype(out_ref.dtype)                                # (1, TS)


# ---------------------------------------------------------------------------
# Helpers
# ---------------------------------------------------------------------------
def _vmem_budget_bytes():
    """Scoped-VMEM budget that is safe on every generation (v7x: 64 MiB phys)."""
    cap = 64 << 20                                   # assume the smallest chip
    try:
        cap = int(getattr(pltpu.get_tpu_info(), "vmem_capacity_bytes", cap))
    except Exception:
        pass
    return max(16 << 20, min(32 << 20, cap // 2))


def _round_up(x, m):
    return -(-x // m) * m


def _pick_tile(S, bytes_per_row, enc_budget_bytes):
    """Rows per streamed encoder tile.

    Big tiles amortize the ~0.35 us per-grid-step overhead.  The tile is a
    multiple of 128 (lane-dense (1, ts) output blocks + (ts, H) sublane rule)
    and is clamped to ~ceil(S/2) so the grid has >= 2 steps for megacore /
    v7x dual-TC sharding of the "parallel" S axis.
    """
    if S <= 512:
        return S                    # single full block; everything is tiny
    rows = (enc_budget_bytes // max(bytes_per_row, 1)) // 512 * 512
    rows = max(512, rows)
    half = _round_up(_round_up(S, 2) // 2, 128)      # ceil(S/2) -> mult of 128
    return max(128, min(rows, half))


# ---------------------------------------------------------------------------
# Wrapper
# ---------------------------------------------------------------------------
class LuongAttentionPallas:
    def __init__(self, hidden_size, method="dot", key=None,
                 compute_dtype=jnp.bfloat16):
        assert method in ("dot", "general", "concat")
        self.method = method
        self.hidden_size = hidden_size
        self.compute_dtype = compute_dtype
        if key is None:
            key = jax.random.PRNGKey(42)
        k_fc, k_w = jax.random.split(key)

        self.fc_weight = None     # f32 master copies (PyTorch (out,in) layout)
        self.weight = None
        self._fc_wt = None        # pre-transposed (in,out) copy fed to kernels
        self._weight_c = None

        if method in ("general", "concat"):
            bound = 1.0 / math.sqrt(hidden_size)
            self.fc_weight = jax.random.uniform(
                k_fc, (hidden_size, hidden_size), jnp.float32, -bound, bound)
            # 'general' stays f32 (mem-bound); 'concat' feeds the MXU in the
            # compute dtype.  Pre-transpose once at init (free), so kernels use
            # plain (M,K)@(K,N) contraction and never relayout the weight.
            wt_dtype = jnp.float32 if method == "general" else compute_dtype
            self._fc_wt = self.fc_weight.T.astype(wt_dtype)
        if method == "concat":
            self.weight = 0.1 * jax.random.normal(
                k_w, (1, hidden_size), jnp.float32)
            self._weight_c = self.weight.astype(compute_dtype)

    def __call__(self, decoder_hidden, encoder_outputs):
        S, H = encoder_outputs.shape
        in_dtype = encoder_outputs.dtype
        in_sz = jnp.dtype(in_dtype).itemsize
        budget = _vmem_budget_bytes()

        # Single query per the module contract.  (The kernels generalize to a
        # (B, H) query block / (B, ts) output block if a caller batches B.)
        dec = decoder_hidden[-1].reshape(1, H).astype(in_dtype)

        dec_spec = pl.BlockSpec((1, H), lambda i: (0, 0))   # resident in VMEM

        if self.method == "dot":
            per_row = 2 * H * in_sz + 2 * 4                 # dbl-buf enc + out
            ts = _pick_tile(S, per_row, max(budget - (4 << 20), 2 << 20))
            grid = (pl.cdiv(S, ts),)
            scores = pl.pallas_call(
                _dot_score_kernel,
                out_shape=jax.ShapeDtypeStruct((1, S), jnp.float32),
                grid=grid,
                in_specs=[dec_spec,
                          pl.BlockSpec((ts, H), lambda i: (i, 0))],
                out_specs=pl.BlockSpec((1, ts), lambda i: (0, i)),
                cost_estimate=pl.CostEstimate(
                    flops=2 * S * H, transcendentals=0,
                    bytes_accessed=(S + 1) * H * in_sz + S * 4),
                compiler_params=pltpu.CompilerParams(
                    dimension_semantics=("parallel",),
                    vmem_limit_bytes=budget),
            )(dec, encoder_outputs)

        elif self.method == "general":
            w_sz = jnp.dtype(self._fc_wt.dtype).itemsize
            res_bytes = 2 * H * H * w_sz + 2 * H * in_sz
            per_row = 2 * H * in_sz + 2 * 4
            ts = _pick_tile(S, per_row,
                            max(budget - res_bytes - (4 << 20), 2 << 20))
            grid = (pl.cdiv(S, ts),)
            scores = pl.pallas_call(
                _general_score_kernel,
                out_shape=jax.ShapeDtypeStruct((1, S), jnp.float32),
                grid=grid,
                in_specs=[dec_spec,
                          pl.BlockSpec((H, H), lambda i: (0, 0)),   # resident W^T
                          pl.BlockSpec((ts, H), lambda i: (i, 0))], # streamed enc
                out_specs=pl.BlockSpec((1, ts), lambda i: (0, i)),
                cost_estimate=pl.CostEstimate(
                    flops=2 * S * H + 2 * H * H * grid[0], transcendentals=0,
                    bytes_accessed=(S + 1) * H * in_sz + H * H * w_sz + S * 4),
                compiler_params=pltpu.CompilerParams(
                    dimension_semantics=("parallel",),
                    vmem_limit_bytes=budget),
            )(dec, self._fc_wt, encoder_outputs)

        else:  # concat
            c_sz = jnp.dtype(self._fc_wt.dtype).itemsize
            res_bytes = 2 * H * H * c_sz + 2 * H * in_sz + 2 * H * c_sz
            # double-buffered enc tile + in-kernel temporaries (x, proj, casts)
            per_row = 2 * H * in_sz + H * (8 + 2 * c_sz) + 2 * 4
            ts = _pick_tile(S, per_row,
                            max(budget - res_bytes - (4 << 20), 2 << 20))
            grid = (pl.cdiv(S, ts),)
            scores = pl.pallas_call(
                _concat_score_kernel,
                out_shape=jax.ShapeDtypeStruct((1, S), jnp.float32),
                grid=grid,
                in_specs=[dec_spec,
                          pl.BlockSpec((H, H), lambda i: (0, 0)),   # resident W^T
                          pl.BlockSpec((1, H), lambda i: (0, 0)),   # resident v
                          pl.BlockSpec((ts, H), lambda i: (i, 0))], # streamed enc
                out_specs=pl.BlockSpec((1, ts), lambda i: (0, i)),
                cost_estimate=pl.CostEstimate(
                    flops=2 * S * H * H + 3 * S * H,
                    transcendentals=S * H,
                    bytes_accessed=(S + 1) * H * in_sz
                                   + (H * H + H) * c_sz + S * 4),
                compiler_params=pltpu.CompilerParams(
                    dimension_semantics=("parallel",),
                    vmem_limit_bytes=budget),
            )(dec, self._fc_wt, self._weight_c, encoder_outputs)

        # Match the PyTorch module's (S, 1) output layout / dtype.
        return scores.reshape(S, 1).astype(in_dtype)


# ---------------------------------------------------------------------------
# Pure-JAX reference (mirrors the PyTorch forward exactly) for validation.
# ---------------------------------------------------------------------------
def _ref(method, decoder_hidden, encoder_outputs, fc_w=None, w=None):
    dec = decoder_hidden[-1]
    if method == "dot":
        return encoder_outputs @ dec.reshape(-1, 1)
    if method == "general":
        out = dec @ fc_w.T
        return encoder_outputs @ out.reshape(-1, 1)
    out = jnp.tanh((dec[None, :] + encoder_outputs) @ fc_w.T)
    return out @ w.reshape(-1, 1)


if __name__ == "__main__":
    key = jax.random.PRNGKey(0)
    ok = True

    # (decoder layers, encoder seq len, hidden size)
    cases = [
        (2, 8, 32),       # small shapes from the module spec (single block)
        (2, 1000, 128),   # exercises the cdiv grid + masked partial last tile
    ]
    for (L, S, H) in cases:
        k1, k2, k3 = jax.random.split(jax.random.fold_in(key, S), 3)
        decoder_hidden = jax.random.normal(k1, (L, H), jnp.float32)
        encoder_outputs = jax.random.normal(k2, (S, H), jnp.float32)

        for method in ("dot", "general", "concat"):
            for cdt, tol in ((jnp.float32, 2e-3), (jnp.bfloat16, 5e-2)):
                attn = LuongAttentionPallas(H, method=method, key=k3,
                                            compute_dtype=cdt)
                scores = jax.block_until_ready(
                    attn(decoder_hidden, encoder_outputs))
                ref = _ref(method, decoder_hidden, encoder_outputs,
                           attn.fc_weight, attn.weight)
                if scores.shape != (S, 1):
                    ok = False
                if not jnp.allclose(scores, ref, atol=tol, rtol=tol):
                    ok = False

    if ok:
        print("KERNEL_OK")
</pallas_src>

<mosaic_0001>
module attributes {stable_mosaic.version = 11 : i64} {
  func.func @_dot_score_kernel(%arg0: i32, %arg1: memref<1x32xf32, #tpu.memory_space<vmem>>, %arg2: memref<8x32xf32, #tpu.memory_space<vmem>>, %arg3: memref<1x8xf32, #tpu.memory_space<vmem>>) attributes {dimension_semantics = [#tpu.dimension_semantics<parallel>], iteration_bounds = array<i64: 1>, scalar_prefetch = 0 : i64, scratch_operands = 0 : i64, tpu.core_type = #tpu.core_type<tc>, window_params = [{pipeline_mode = #tpu.pipeline_mode<synchronous>, transform_indices = @transform_0, window_bounds = array<i64: 1, 32>}, {transform_indices = @transform_1, window_bounds = array<i64: 8, 32>}, {transform_indices = @transform_2, window_bounds = array<i64: 1, 8>}]} {
    %c0 = arith.constant 0 : index
    %c0_0 = arith.constant 0 : index
    %0 = vector.load %arg1[%c0, %c0_0] : memref<1x32xf32, #tpu.memory_space<vmem>>, vector<1x32xf32>
    %c0_1 = arith.constant 0 : index
    %c0_2 = arith.constant 0 : index
    %1 = vector.load %arg2[%c0_1, %c0_2] : memref<8x32xf32, #tpu.memory_space<vmem>>, vector<8x32xf32>
    %cst = arith.constant dense<0.000000e+00> : vector<1x8xf32>
    %2 = tpu.matmul %0, %1, %cst {dimension_numbers = #tpu.dot_dimension_numbers<[1], [1], [0], [0], [0, 0, 1, 0], [], []>} : vector<1x32xf32>, vector<8x32xf32>, vector<1x8xf32> -> vector<1x8xf32>
    %c0_3 = arith.constant 0 : index
    %c0_4 = arith.constant 0 : index
    %3 = vector.load %arg3[%c0_3, %c0_4] : memref<1x8xf32, #tpu.memory_space<vmem>>, vector<1x8xf32>
    tpu.vector_store %arg3[%c0_3, %c0_4], %2 {strides = array<i32>} : memref<1x8xf32, #tpu.memory_space<vmem>>, vector<1x8xf32>,
    return
  }
  func.func @transform_0(%arg0: i32) -> (i32, i32) {
    %c0_i32 = arith.constant 0 : i32
    %c0_i32_0 = arith.constant 0 : i32
    %c0_i32_1 = arith.constant 0 : i32
    return %c0_i32, %c0_i32_0 : i32, i32
  }
  func.func @transform_1(%arg0: i32) -> (i32, i32) {
    %c0_i32 = arith.constant 0 : i32
    %c0_i32_0 = arith.constant 0 : i32
    return %arg0, %c0_i32 : i32, i32
  }
  func.func @transform_2(%arg0: i32) -> (i32, i32) {
    %c0_i32 = arith.constant 0 : i32
    %c0_i32_0 = arith.constant 0 : i32
    return %c0_i32, %arg0 : i32, i32
  }
}

</mosaic_0001>

<bundles_post_ra>
// kernel: tpu_custom_call.1
= control target key start
LH: loop header
LB: loop body
LE: loop exit
PB: predicated region body
PF: predicated region fallthrough
CT: control target
= control target key end

     0   :  { %7 = vsyncpa [#allocation3], 0  ;;  %s242_s0 = inlined_call_operand.hbm [shape: f32[1,32], index: 0, kind: input, shape index: {}]   ;;  %s243_s1 = inlined_call_operand.hbm [shape: f32[8,32], index: 1, kind: input, shape index: {}]   ;;  %s244_s2 = inlined_call_operand.hbm [shape: f32[1,8], index: 2, kind: output, shape index: {}]  }
   0x1   :  { %8 = vsyncpa [#allocation6], 0 }
   0x2   :  { %9 = vsyncpa [#allocation4], 0  ;;  %s213_s9 = smov [#allocation2]   ;;  %s214_s11 = smov [#allocation5]  }
   0x3   :  { %s16_s10 = sshll.u32 %s213_s9, 4  ;;  %s26_s12 = sshll.u32 %s214_s11, 4  ;;  %s17_s10 = int_to_ptr.vmem [resolvable:$true] %s16_s10  ;;  %s27_s12 = int_to_ptr.vmem [resolvable:$true] %s26_s12 }
   0x4   :  { %s155_s13 = scalar_lea.vmem %s17_s10, 16  ;;  %s159_s14 = scalar_lea.vmem %s17_s10, 32 }
   0x5   :  { %p156_p0 = scmp.ne.s32.totalorder %s17_s10, %s155_s13  ;;  %p160_p1 = scmp.lt.s32.totalorder %s17_s10, %s17_s10 }
   0x6   :  { %p161_p2 = scmp.lt.s32.totalorder %s159_s14, %s155_s13 }
   0x8   :  { %p162_p3 = por %p161_p2, %p160_p1 }
   0xa   :  { %p163_p4 = pnand %p162_p3, %p156_p0 }
   0xc   :  { %166 = shalt.err (!%p163_p4)
}
   0xd   :  { %19 = dma.hbm_to_vmem [thread:$0]  %s242_s0, 16, %s17_s10, [#allocation3]  }
   0xe   :  { %s175_s17 = scalar_lea.vmem %s27_s12, 128  ;;  %p180_p6 = scmp.lt.s32.totalorder %s27_s12, %s27_s12 }
   0xf   :  { %p176_p5 = scmp.ne.s32.totalorder %s27_s12, %s175_s17  ;;  %p181_p7 = scmp.lt.s32.totalorder %s175_s17, %s175_s17 }
  0x11   :  { %p182_p8 = por %p181_p7, %p180_p6 }
  0x13   :  { %p183_p9 = pnand %p182_p8, %p176_p5 }
  0x15   :  { %186 = shalt.err (!%p183_p9)
}
  0x16   :  { %29 = dma.hbm_to_vmem [thread:$0]  %s243_s1, 128, %s27_s12, [#allocation6]  }
  0x17   :  { %207 = dma.done.wait [#allocation3], 16  }
  0x18   :  { %208 = vsyncadd [#allocation3], 4294967280 }
  0x19   :  { %209 = dma.done.wait [#allocation6], 128  }
  0x1a   :  { %210 = vsyncadd [#allocation6], 4294967168  ;;  %v215_v0 = vmov 0.0   ;;  %vm216_vm0 = vmmov 0   ;;  %vm38_vm1 = vcmask 261120   ;;  %v37_v1 = vld [vmem:[#allocation5] sm:$0xff] }
  0x1b   :  { %137 = vmatprep.subr.mxu0 %v215_v0  ;;  %139 = vmatprep.mubr.msk.f32.mxu0 %vm216_vm0, %v215_v0  ;;  %v36_v2 = vld [vmem:[#allocation2] sm:$0x1]  ;;  %s217_s0 = smov [#allocation7]   ;;  %vm115_vm2 = vcmask 57344  }
  0x1c   :  { %138 = vmatpush3.xpose.msk.msra.mxu0 %vm38_vm1, %v37_v1  ;;  %s123_s20 = sshll.u32 %s217_s0, 4  ;;  %s124_s20 = int_to_ptr.vmem [resolvable:$true] %s123_s20 }
  0x1d   :  { %s187_s1 = scalar_lea.vmem %s124_s20, 16  ;;  %s191_s21 = scalar_lea.vmem %s124_s20, 32 }
  0x1e   :  { %p188_p10 = scmp.ne.s32.totalorder %s124_s20, %s187_s1  ;;  %p192_p11 = scmp.lt.s32.totalorder %s124_s20, %s124_s20 }
  0x1f   :  { %140 = vmatmul.mubr.msk.f32.vlgmr.msra.gmra.mxu0 %vm38_vm1, %v36_v2  ;;  %p193_p12 = scmp.lt.s32.totalorder %s191_s21, %s187_s1 }
  0x21   :  { %p194_p13 = por %p193_p12, %p192_p11 }
  0x23   :  { %p195_p0 = pnand %p194_p13, %p188_p10 }
  0xdf   :  { %v111_v3 = vpop.f32.mrf.mxu0 }
  0xe0   :  { %116 = vst.msk [vmem:[#allocation7] sm:$0x1] %vm115_vm2, %v111_v3 }
  0xe1   :  { %v141_v4 = vpop.f32.mrf.mxu0 }
  0xe2   :  { %198 = shalt.err (!%p195_p0)
}
  0xe3   :  { %126 = dma.vmem_to_hbm [thread:$0]  %s124_s20, 16, %s244_s2, [#allocation4]  }
  0xe4   :  { %211 = dma.done.wait [#allocation4], 16  }
  0xe5   :  { %212 = vsyncadd [#allocation4], 4294967280 }
  0xe6   :  { %130 = vsyncpa [#allocation3], 1 }
  0xe7   :  { %131 = vsyncpa [#allocation6], 1 }
  0xe8   :  { %132 = vsyncpa [#allocation4], 1 }

</bundles_post_ra>
